<compile_context>
chip_gen: v6e
topology: v6e:2x2x1
jax: 0.10.0
libtpu: 0.0.40
codegen_flags: <defaults>
</compile_context>

<pallas_src>
import jax
import jax.numpy as jnp
from jax.experimental import pallas as pl
from jax.experimental.pallas import tpu as pltpu

_ROWS = 8              # sublane fill
_MAX_TD = 64 * 1024    # lanes per tile: 8 * 65536 * 4 B = 2 MiB f32 per input tile


def _make_bce_kernel(td, tiles_per_split, d2, needs_mask):
    def kernel(p_ref, t_ref, out_ref, acc_ref):
        # p_ref / t_ref: (_ROWS, td) tile in VMEM (native dtype)
        # out_ref:       (1, _ROWS, 1) per-split partial sums
        # acc_ref:       (_ROWS, 1) float32 accumulator, persists across k
        k = pl.program_id(1)

        @pl.when(k == 0)
        def _():
            acc_ref[...] = jnp.zeros_like(acc_ref)

        p = p_ref[...].astype(jnp.float32)
        t = t_ref[...].astype(jnp.float32)

        # Same clamp (-100) torch.nn.BCELoss applies to the logs. Keep the
        # two-log form so non-binary (soft) targets remain exact.
        log_p = jnp.maximum(jnp.log(p), -100.0)
        log_1mp = jnp.maximum(jnp.log(1.0 - p), -100.0)
        bce = -(t * log_p + (1.0 - t) * log_1mp)

        if needs_mask:
            # Zero out columns past the valid extent (partial last tile and
            # any duplicated tile created by the even megacore split).
            s = pl.program_id(0)
            col0 = (s * tiles_per_split + k) * td
            cols = col0 + jax.lax.broadcasted_iota(jnp.int32, bce.shape, 1)
            bce = jnp.where(cols < d2, bce, 0.0)

        acc_ref[...] += jnp.sum(bce, axis=1, keepdims=True)  # (_ROWS, 1)

        @pl.when(k == pl.num_programs(1) - 1)
        def _():
            out_ref[...] = acc_ref[...].reshape(out_ref.shape)

    return kernel


@jax.jit
def bce_loss(pred, target):
    """pred, target: same shape (e.g. (B, C, H, W)), pred in (0, 1).

    Returns (bce, {'loss/bce': bce}) with mean reduction over all elements,
    matching torch.nn.BCELoss(reduction='mean').
    """
    n = pred.size
    pred_flat = pred.reshape(-1)
    tgt_flat = target.reshape(-1)

    # Only pad (a whole-array copy) in the rare n % 8 != 0 case; pad values
    # (p=1, t=1) contribute exactly 0 to the sum.
    if n % _ROWS != 0:
        n_pad = _ROWS - (n % _ROWS)
        pred_flat = jnp.pad(pred_flat, (0, n_pad), constant_values=1.0)
        tgt_flat = jnp.pad(tgt_flat, (0, n_pad), constant_values=1.0)
    d2 = pred_flat.size // _ROWS

    # Free (bitcast) reshape under jit: same row-major linear order.
    pred2d = pred_flat.reshape(_ROWS, d2)
    tgt2d = tgt_flat.reshape(_ROWS, d2)

    if d2 <= _MAX_TD:
        td = d2                       # single full-extent tile (allowed: equals array dim)
        num_tiles = 1
    else:
        td = _MAX_TD                  # multiple of 128
        num_tiles = pl.cdiv(d2, td)

    nsplit = 2 if num_tiles >= 2 else 1        # let v7x's two TCs split the stream
    tiles_per_split = pl.cdiv(num_tiles, nsplit)
    total_cols = nsplit * tiles_per_split * td
    needs_mask = total_cols != d2

    kernel = _make_bce_kernel(td, tiles_per_split, d2, needs_mask)

    last_tile = num_tiles - 1

    def in_map(s, k):
        # Clamp so no block is ever fully out-of-bounds; duplicated tiles are
        # zeroed by the in-kernel column mask.
        return (0, jnp.minimum(s * tiles_per_split + k, last_tile))

    partials = pl.pallas_call(
        kernel,
        out_shape=jax.ShapeDtypeStruct((nsplit, _ROWS, 1), jnp.float32),
        grid=(nsplit, tiles_per_split),
        in_specs=[
            pl.BlockSpec((_ROWS, td), in_map),
            pl.BlockSpec((_ROWS, td), in_map),
        ],
        out_specs=pl.BlockSpec((1, _ROWS, 1), lambda s, k: (s, 0, 0)),
        scratch_shapes=[pltpu.VMEM((_ROWS, 1), jnp.float32)],
        compiler_params=pltpu.CompilerParams(
            dimension_semantics=("parallel", "arbitrary")),
    )(pred2d, tgt2d)

    bce = jnp.sum(partials) / n
    return bce, {"loss/bce": bce}


def _bce_reference(pred, target):
    p = pred.astype(jnp.float32)
    t = target.astype(jnp.float32)
    log_p = jnp.maximum(jnp.log(p), -100.0)
    log_1mp = jnp.maximum(jnp.log(1.0 - p), -100.0)
    return jnp.mean(-(t * log_p + (1.0 - t) * log_1mp))


if __name__ == "__main__":
    key = jax.random.PRNGKey(0)
    k1, k2 = jax.random.split(key)

    B, C, H, W = 2, 4, 16, 16
    # pred must be probabilities in (0, 1) for BCELoss
    pred = jax.nn.sigmoid(jax.random.normal(k1, (B, C, H, W), dtype=jnp.float32))
    # binary target (float, as BCELoss expects float targets)
    target = jax.random.bernoulli(k2, p=0.5, shape=(B, C, H, W)).astype(jnp.float32)

    loss, logs = bce_loss(pred, target)
    jax.block_until_ready(loss)
    jax.block_until_ready(logs["loss/bce"])

    ref = _bce_reference(pred, target)
    assert jnp.allclose(loss, ref, rtol=1e-5, atol=1e-6), (float(loss), float(ref))

    print("KERNEL_OK")
</pallas_src>

<mosaic_0001>
module attributes {stable_mosaic.version = 11 : i64} {
  func.func @kernel(%arg0: i32, %arg1: i32, %arg2: memref<8x256xf32, #tpu.memory_space<vmem>>, %arg3: memref<8x256xf32, #tpu.memory_space<vmem>>, %arg4: memref<1x8x1xf32, #tpu.memory_space<vmem>>, %arg5: memref<8x1xf32, #tpu.memory_space<vmem>>) attributes {dimension_semantics = [#tpu.dimension_semantics<parallel>, #tpu.dimension_semantics<arbitrary>], iteration_bounds = array<i64: 1, 1>, scalar_prefetch = 0 : i64, scratch_operands = 1 : i64, tpu.core_type = #tpu.core_type<tc>, window_params = [{transform_indices = @transform_0, window_bounds = array<i64: 8, 256>}, {transform_indices = @transform_1, window_bounds = array<i64: 8, 256>}, {transform_indices = @transform_2, window_bounds = array<i64: 1, 8, 1>}]} {
    %c0_i32 = arith.constant 0 : i32
    %0 = arith.cmpi eq, %arg1, %c0_i32 : i32
    %1 = arith.extui %0 : i1 to i32
    %c0_i32_0 = arith.constant 0 : i32
    %2 = arith.cmpi ne, %1, %c0_i32_0 : i32
    scf.if %2 {
      %cst_15 = arith.constant 0.000000e+00 : f32
      %28 = vector.broadcast %cst_15 : f32 to vector<8x1xf32>
      %c0_16 = arith.constant 0 : index
      %c0_17 = arith.constant 0 : index
      %29 = vector.load %arg5[%c0_16, %c0_17] : memref<8x1xf32, #tpu.memory_space<vmem>>, vector<8x1xf32>
      tpu.vector_store %arg5[%c0_16, %c0_17], %28 {strides = array<i32>} : memref<8x1xf32, #tpu.memory_space<vmem>>, vector<8x1xf32>,
    } else {
    }
    %c0 = arith.constant 0 : index
    %c0_1 = arith.constant 0 : index
    %3 = vector.load %arg2[%c0, %c0_1] : memref<8x256xf32, #tpu.memory_space<vmem>>, vector<8x256xf32>
    %c0_2 = arith.constant 0 : index
    %c0_3 = arith.constant 0 : index
    %4 = vector.load %arg3[%c0_2, %c0_3] : memref<8x256xf32, #tpu.memory_space<vmem>>, vector<8x256xf32>
    %5 = math.log %3 : vector<8x256xf32>
    %cst = arith.constant -1.000000e+02 : f32
    %6 = vector.broadcast %cst : f32 to vector<8x256xf32>
    %7 = arith.maximumf %5, %6 : vector<8x256xf32>
    %cst_4 = arith.constant 1.000000e+00 : f32
    %8 = vector.broadcast %cst_4 : f32 to vector<8x256xf32>
    %9 = arith.subf %8, %3 : vector<8x256xf32>
    %10 = math.log %9 : vector<8x256xf32>
    %cst_5 = arith.constant -1.000000e+02 : f32
    %11 = vector.broadcast %cst_5 : f32 to vector<8x256xf32>
    %12 = arith.maximumf %10, %11 : vector<8x256xf32>
    %13 = arith.mulf %4, %7 : vector<8x256xf32>
    %cst_6 = arith.constant 1.000000e+00 : f32
    %14 = vector.broadcast %cst_6 : f32 to vector<8x256xf32>
    %15 = arith.subf %14, %4 : vector<8x256xf32>
    %16 = arith.mulf %15, %12 : vector<8x256xf32>
    %17 = arith.addf %13, %16 : vector<8x256xf32>
    %cst_7 = arith.constant 0.000000e+00 : f32
    %18 = vector.broadcast %cst_7 : f32 to vector<8x256xf32>
    %19 = arith.subf %18, %17 : vector<8x256xf32>
    %c0_8 = arith.constant 0 : index
    %c0_9 = arith.constant 0 : index
    %20 = vector.load %arg5[%c0_8, %c0_9] : memref<8x1xf32, #tpu.memory_space<vmem>>, vector<8x1xf32>
    %cst_10 = arith.constant dense<0.000000e+00> : vector<8xf32>
    %21 = vector.multi_reduction <add>, %19, %cst_10 [1] : vector<8x256xf32> to vector<8xf32>
    %22 = vector.shape_cast %21 : vector<8xf32> to vector<8x1xf32>
    %23 = arith.addf %20, %22 : vector<8x1xf32>
    %c0_11 = arith.constant 0 : index
    %c0_12 = arith.constant 0 : index
    %24 = vector.load %arg5[%c0_11, %c0_12] : memref<8x1xf32, #tpu.memory_space<vmem>>, vector<8x1xf32>
    tpu.vector_store %arg5[%c0_11, %c0_12], %23 {strides = array<i32>} : memref<8x1xf32, #tpu.memory_space<vmem>>, vector<8x1xf32>,
    %c0_i32_13 = arith.constant 0 : i32
    %25 = arith.cmpi eq, %arg1, %c0_i32_13 : i32
    %26 = arith.extui %25 : i1 to i32
    %c0_i32_14 = arith.constant 0 : i32
    %27 = arith.cmpi ne, %26, %c0_i32_14 : i32
    scf.if %27 {
      %c0_15 = arith.constant 0 : index
      %c0_16 = arith.constant 0 : index
      %28 = vector.load %arg5[%c0_15, %c0_16] : memref<8x1xf32, #tpu.memory_space<vmem>>, vector<8x1xf32>
      %29 = vector.shape_cast %28 : vector<8x1xf32> to vector<1x8x1xf32>
      %c0_17 = arith.constant 0 : index
      %c0_18 = arith.constant 0 : index
      %c0_19 = arith.constant 0 : index
      %30 = vector.load %arg4[%c0_17, %c0_18, %c0_19] : memref<1x8x1xf32, #tpu.memory_space<vmem>>, vector<1x8x1xf32>
      tpu.vector_store %arg4[%c0_17, %c0_18, %c0_19], %29 {strides = array<i32>} : memref<1x8x1xf32, #tpu.memory_space<vmem>>, vector<1x8x1xf32>,
    } else {
    }
    return
  }
  func.func @transform_0(%arg0: i32, %arg1: i32) -> (i32, i32) {
    %c1_i32 = arith.constant 1 : i32
    %0 = arith.muli %arg0, %c1_i32 : i32
    %1 = arith.addi %0, %arg1 : i32
    %c0_i32 = arith.constant 0 : i32
    %2 = arith.minsi %1, %c0_i32 : i32
    %c0_i32_0 = arith.constant 0 : i32
    %c0_i32_1 = arith.constant 0 : i32
    return %c0_i32_0, %2 : i32, i32
  }
  func.func @transform_1(%arg0: i32, %arg1: i32) -> (i32, i32) {
    %c1_i32 = arith.constant 1 : i32
    %0 = arith.muli %arg0, %c1_i32 : i32
    %1 = arith.addi %0, %arg1 : i32
    %c0_i32 = arith.constant 0 : i32
    %2 = arith.minsi %1, %c0_i32 : i32
    %c0_i32_0 = arith.constant 0 : i32
    %c0_i32_1 = arith.constant 0 : i32
    return %c0_i32_0, %2 : i32, i32
  }
  func.func @transform_2(%arg0: i32, %arg1: i32) -> (i32, i32, i32) {
    %c0_i32 = arith.constant 0 : i32
    %c0_i32_0 = arith.constant 0 : i32
    %c0_i32_1 = arith.constant 0 : i32
    return %arg0, %c0_i32, %c0_i32_0 : i32, i32, i32
  }
}

</mosaic_0001>

<bundles_post_ra>
// kernel: bce_loss.1
= control target key start
LH: loop header
LB: loop body
LE: loop exit
PB: predicated region body
PF: predicated region fallthrough
CT: control target
= control target key end

     0   :  { %vm79_vm0 = vcmask 7168   ;;  %v146_v2 = vmov 0.0   ;;  %s180_s0 = inlined_call_operand.vmem [shape: f32[8,256], index: 0, kind: input, shape index: {}]   ;;  %s181_s1 = inlined_call_operand.vmem [shape: f32[8,256], index: 1, kind: input, shape index: {}]   ;;  %s182_s2 = inlined_call_operand.vmem [shape: f32[1,8,1], index: 2, kind: output, shape index: {}]  }
   0x1   :  { %v81_v0 = vld [vmem:[%s180_s0] sm:$0xff]  ;;  %v82_v1 = vld [vmem:[%s180_s0 + $0x8] sm:$0xff]  ;;  %80 = vst.msk [vmem:[#allocation2] sm:$0xff] %vm79_vm0, %v146_v2 }
   0x2   :  { %138 = vlog2.f32 %v81_v0  ;;  %v91_v3 = vsub.f32 1.0, %v81_v0  ;;  %v92_v4 = vsub.f32 1.0, %v82_v1  ;;  %v83_v6 = vld [vmem:[%s181_s1] sm:$0xff]  ;;  %v84_v8 = vld [vmem:[%s181_s1 + $0x8] sm:$0xff] }
   0x3   :  { %140 = vlog2.f32 %v82_v1  ;;  %v101_v15 = vsub.f32 1.0, %v83_v6  ;;  %v102_v18 = vsub.f32 1.0, %v84_v8 }
   0x4   :  { %142 = vlog2.f32 %v91_v3 }
   0x5   :  { %144 = vlog2.f32 %v92_v4 }
   0x8   :  { %v109_v30 = vld [vmem:[#allocation2] sm:$0xff] }
   0xf   :  { %v139_v5 = vpop.eup %138 }
  0x10   :  { %v141_v7 = vpop.eup %140  ;;  %v86_v9 = vmul.f32 0.6931472, %v139_v5 }
  0x11   :  { %v143_v10 = vpop.eup %142  ;;  %v88_v11 = vmul.f32 0.6931472, %v141_v7 }
  0x12   :  { %v145_v12 = vpop.eup %144  ;;  %v89_v13 = vmax.f32 %v86_v9, -100.0  ;;  %v94_v14 = vmul.f32 0.6931472, %v143_v10 }
  0x13   :  { %v90_v16 = vmax.f32 %v88_v11, -100.0  ;;  %v96_v17 = vmul.f32 0.6931472, %v145_v12 }
  0x14   :  { %v97_v19 = vmax.f32 %v94_v14, -100.0  ;;  %v99_v20 = vmul.f32 %v89_v13, %v83_v6 }
  0x15   :  { %v98_v21 = vmax.f32 %v96_v17, -100.0  ;;  %v100_v22 = vmul.f32 %v90_v16, %v84_v8 }
  0x16   :  { %v103_v23 = vmul.f32 %v101_v15, %v97_v19 }
  0x17   :  { %v104_v24 = vmul.f32 %v102_v18, %v98_v21 }
  0x18   :  { %v105_v25 = vadd.f32 %v103_v23, %v99_v20 }
  0x19   :  { %v106_v26 = vadd.f32 %v104_v24, %v100_v22 }
  0x1a   :  { %v107_v27 = vsub.f32 0.0, %v105_v25 }
  0x1b   :  { %v108_v28 = vsub.f32 0.0, %v106_v26 }
  0x1d   :  { %v110_v29 = vadd.f32 %v108_v28, %v107_v27 }
  0x1f   :  { %111 = vadd.xlane.f32.xlu0 %v110_v29 }
  0xa8   :  { %v112_v31 = vpop.xlane.xlu0 %111 }
  0xa9   :  { %v113_v32 = vadd.f32 %v112_v31, %v109_v30 }
  0xab   :  { %115 = vst.msk [vmem:[#allocation2] sm:$0xff] %vm79_vm0, %v113_v32 }
  0xb2   :  { %v119_v33 = vld [vmem:[#allocation2] sm:$0xff] }
  0xb3   :  { %120 = vst.msk [vmem:[%s182_s2] sm:$0xff] %vm79_vm0, %v119_v33 }

</bundles_post_ra>
